<compile_context>
chip_gen: v6e
topology: v6e:2x2x1
jax: 0.10.0
libtpu: 0.0.40
codegen_flags: <defaults>
</compile_context>

<pallas_src>
import functools

import jax
import jax.numpy as jnp
from jax.experimental import pallas as pl
from jax.experimental.pallas import tpu as pltpu


def _round_up(n, m):
    return ((n + m - 1) // m) * m


def _choose_block_b(B, requested):
    """Batch tile: big (amortize ~0.35us/step), 256-aligned for the MXU row
    tile, >=2 grid steps for the v7x megacore when possible, never larger than
    the batch (keeps partial-block handling to the final block only)."""
    if B <= 8:
        return max(B, 1)                              # single full-dim block
    bb = _round_up(max(requested, 256), 256)          # MXU row-tile alignment
    bb = min(bb, _round_up(pl.cdiv(B, 2), 256))       # >=2 steps -> both v7x TCs
    bb = min(bb, (B // 8) * 8)                        # don't exceed the batch
    return max(bb, 8)


def policy_kernel(x_ref, w1_ref, b1_ref, w2_ref, b2_ref, o_ref, *, matmul_dtype):
    def mm(a):
        # Cast matmul operands only if needed (no-op when pre-cast at init).
        return a if a.dtype == matmul_dtype else a.astype(matmul_dtype)

    # fc1 on the MXU, f32 accumulate; bias add + ReLU on the VPU in f32.
    h = jnp.dot(mm(x_ref[...]), mm(w1_ref[...]), preferred_element_type=jnp.float32)
    h = jnp.maximum(h + b1_ref[...].astype(jnp.float32), 0.0)     # (tb,128)+(1,128)

    # fc2
    logits = jnp.dot(mm(h), mm(w2_ref[...]), preferred_element_type=jnp.float32)
    logits = logits + b2_ref[...].astype(jnp.float32)             # (tb,O)+(1,O)

    # Numerically stable softmax over the last axis with EXACT normalization
    # (probabilities feed PPO ratios / categorical sampling downstream).
    m = jnp.max(logits, axis=-1, keepdims=True)
    e = jnp.exp(logits - m)
    denom = jnp.sum(e, axis=-1, keepdims=True)
    o_ref[...] = (e / denom).astype(o_ref.dtype)


def policy_forward(x, w1, b1, w2, b2, *, block_b=4096, matmul_dtype=jnp.float32):
    """x: (B, input_size); w1: (input_size, 128); b1: (1, 128);
       w2: (128, output_size); b2: (1, output_size) -> (B, output_size) f32.
       Weights/biases may already be in matmul_dtype (recommended for bf16)."""
    B, K = x.shape
    H = w1.shape[1]
    O = w2.shape[1]

    bb = _choose_block_b(B, block_b)
    grid = (pl.cdiv(B, bb),)
    rows = grid[0] * bb

    flops = 2 * rows * (K * H + H * O)                  # two matmuls
    transcendentals = rows * O                          # exp
    itemsize = jnp.dtype(x.dtype).itemsize
    bytes_accessed = (itemsize * B * K                  # x
                      + jnp.dtype(w1.dtype).itemsize * (K * H + H)
                      + jnp.dtype(w2.dtype).itemsize * (H * O + O)
                      + 4 * B * O)                      # probs out (f32)

    return pl.pallas_call(
        functools.partial(policy_kernel, matmul_dtype=matmul_dtype),
        out_shape=jax.ShapeDtypeStruct((B, O), jnp.float32),
        grid=grid,
        in_specs=[
            pl.BlockSpec((bb, K), lambda i: (i, 0)),
            # Weights/biases: constant block index -> VMEM-resident across the
            # whole batch grid (fetched once, no per-step re-DMA).
            pl.BlockSpec((K, H), lambda i: (0, 0)),
            pl.BlockSpec((1, H), lambda i: (0, 0)),
            pl.BlockSpec((H, O), lambda i: (0, 0)),
            pl.BlockSpec((1, O), lambda i: (0, 0)),
        ],
        out_specs=pl.BlockSpec((bb, O), lambda i: (i, 0)),
        compiler_params=pltpu.CompilerParams(
            dimension_semantics=("parallel",)),          # megacore split on v7x
        cost_estimate=pl.CostEstimate(
            flops=flops,
            transcendentals=transcendentals,
            bytes_accessed=bytes_accessed),
    )(x, w1, b1, w2, b2)


def init_policy_params(key, input_size, output_size, hidden=128, dtype=jnp.float32):
    """PyTorch default Linear init: U(-1/sqrt(fan_in), 1/sqrt(fan_in)).
       Pass dtype=jnp.bfloat16 to store params pre-cast for the bf16 MXU path."""
    k1, k2, k3, k4 = jax.random.split(key, 4)
    bound1 = 1.0 / jnp.sqrt(jnp.float32(input_size))
    bound2 = 1.0 / jnp.sqrt(jnp.float32(hidden))
    w1 = jax.random.uniform(k1, (input_size, hidden), jnp.float32, -bound1, bound1)
    b1 = jax.random.uniform(k2, (1, hidden), jnp.float32, -bound1, bound1)
    w2 = jax.random.uniform(k3, (hidden, output_size), jnp.float32, -bound2, bound2)
    b2 = jax.random.uniform(k4, (1, output_size), jnp.float32, -bound2, bound2)
    return tuple(a.astype(dtype) for a in (w1, b1, w2, b2))


def _reference(x, w1, b1, w2, b2):
    x32 = x.astype(jnp.float32)
    h = jnp.maximum(x32 @ w1.astype(jnp.float32) + b1.astype(jnp.float32), 0.0)
    return jax.nn.softmax(h @ w2.astype(jnp.float32) + b2.astype(jnp.float32), axis=-1)


if __name__ == "__main__":
    key = jax.random.PRNGKey(0)
    kx, kp, kb = jax.random.split(key, 3)

    input_size = 8      # small observation vector
    output_size = 4     # small discrete action space
    w1, b1, w2, b2 = init_policy_params(kp, input_size, output_size)

    # --- small single-tile call (f32 path, exact softmax) ---------------------
    batch = 8
    x = jax.random.normal(kx, (batch, input_size), jnp.float32)
    probs = jax.block_until_ready(policy_forward(x, w1, b1, w2, b2))
    probs_ref = _reference(x, w1, b1, w2, b2)
    assert probs.shape == (batch, output_size)
    assert jnp.allclose(probs, probs_ref, atol=1e-5, rtol=1e-5)
    assert jnp.allclose(jnp.sum(probs, axis=-1), 1.0, atol=1e-5)

    # --- larger batch: cdiv grid (no pad copy), >=2 steps, bf16 MXU path ------
    big_batch = 300  # not a tile multiple -> exercises the partial final block
    xb = jax.random.normal(kb, (big_batch, input_size), jnp.float32).astype(jnp.bfloat16)
    w1b, b1b, w2b, b2b = (a.astype(jnp.bfloat16) for a in (w1, b1, w2, b2))  # pre-cast once
    probs_b = jax.block_until_ready(
        policy_forward(xb, w1b, b1b, w2b, b2b, matmul_dtype=jnp.bfloat16))
    probs_b_ref = _reference(xb, w1, b1, w2, b2)
    assert probs_b.shape == (big_batch, output_size)
    assert jnp.allclose(probs_b, probs_b_ref, atol=2e-2, rtol=2e-2)   # bf16 tolerance
    assert jnp.allclose(jnp.sum(probs_b, axis=-1), 1.0, atol=1e-3)    # exact normalize

    print("KERNEL_OK")
</pallas_src>

<mosaic_0001>
module attributes {stable_mosaic.version = 11 : i64} {
  func.func @policy_kernel(%arg0: i32, %arg1: memref<8x8xf32, #tpu.memory_space<vmem>>, %arg2: memref<8x128xf32, #tpu.memory_space<vmem>>, %arg3: memref<1x128xf32, #tpu.memory_space<vmem>>, %arg4: memref<128x4xf32, #tpu.memory_space<vmem>>, %arg5: memref<1x4xf32, #tpu.memory_space<vmem>>, %arg6: memref<8x4xf32, #tpu.memory_space<vmem>>) attributes {dimension_semantics = [#tpu.dimension_semantics<parallel>], iteration_bounds = array<i64: 1>, scalar_prefetch = 0 : i64, scratch_operands = 0 : i64, tpu.core_type = #tpu.core_type<tc>, window_params = [{transform_indices = @transform_0, window_bounds = array<i64: 8, 8>}, {pipeline_mode = #tpu.pipeline_mode<synchronous>, transform_indices = @transform_1, window_bounds = array<i64: 8, 128>}, {pipeline_mode = #tpu.pipeline_mode<synchronous>, transform_indices = @transform_2, window_bounds = array<i64: 1, 128>}, {pipeline_mode = #tpu.pipeline_mode<synchronous>, transform_indices = @transform_3, window_bounds = array<i64: 128, 4>}, {pipeline_mode = #tpu.pipeline_mode<synchronous>, transform_indices = @transform_4, window_bounds = array<i64: 1, 4>}, {transform_indices = @transform_5, window_bounds = array<i64: 8, 4>}]} {
    %c0 = arith.constant 0 : index
    %c0_0 = arith.constant 0 : index
    %0 = vector.load %arg1[%c0, %c0_0] : memref<8x8xf32, #tpu.memory_space<vmem>>, vector<8x8xf32>
    %c0_1 = arith.constant 0 : index
    %c0_2 = arith.constant 0 : index
    %1 = vector.load %arg2[%c0_1, %c0_2] : memref<8x128xf32, #tpu.memory_space<vmem>>, vector<8x128xf32>
    %cst = arith.constant dense<0.000000e+00> : vector<8x128xf32>
    %2 = tpu.matmul %0, %1, %cst {dimension_numbers = #tpu.dot_dimension_numbers<[1], [0], [0], [1], [0, 0, 1, 1], [], []>} : vector<8x8xf32>, vector<8x128xf32>, vector<8x128xf32> -> vector<8x128xf32>
    %c0_3 = arith.constant 0 : index
    %c0_4 = arith.constant 0 : index
    %3 = vector.load %arg3[%c0_3, %c0_4] : memref<1x128xf32, #tpu.memory_space<vmem>>, vector<1x128xf32>
    %4 = vector.broadcast %3 : vector<1x128xf32> to vector<8x128xf32>
    %5 = arith.addf %2, %4 : vector<8x128xf32>
    %cst_5 = arith.constant 0.000000e+00 : f32
    %6 = vector.broadcast %cst_5 : f32 to vector<8x128xf32>
    %7 = arith.maximumf %5, %6 : vector<8x128xf32>
    %c0_6 = arith.constant 0 : index
    %c0_7 = arith.constant 0 : index
    %8 = vector.load %arg4[%c0_6, %c0_7] : memref<128x4xf32, #tpu.memory_space<vmem>>, vector<128x4xf32>
    %cst_8 = arith.constant dense<0.000000e+00> : vector<8x4xf32>
    %9 = tpu.matmul %7, %8, %cst_8 {dimension_numbers = #tpu.dot_dimension_numbers<[1], [0], [0], [1], [0, 0, 1, 1], [], []>} : vector<8x128xf32>, vector<128x4xf32>, vector<8x4xf32> -> vector<8x4xf32>
    %c0_9 = arith.constant 0 : index
    %c0_10 = arith.constant 0 : index
    %10 = vector.load %arg5[%c0_9, %c0_10] : memref<1x4xf32, #tpu.memory_space<vmem>>, vector<1x4xf32>
    %11 = vector.broadcast %10 : vector<1x4xf32> to vector<8x4xf32>
    %12 = arith.addf %9, %11 : vector<8x4xf32>
    %cst_11 = arith.constant dense<0xFF800000> : vector<8xf32>
    %13 = vector.multi_reduction <maximumf>, %12, %cst_11 [1] : vector<8x4xf32> to vector<8xf32>
    %14 = vector.shape_cast %13 : vector<8xf32> to vector<8x1xf32>
    %15 = vector.broadcast %14 : vector<8x1xf32> to vector<8x4xf32>
    %16 = arith.subf %12, %15 : vector<8x4xf32>
    %17 = math.exp %16 : vector<8x4xf32>
    %cst_12 = arith.constant dense<0.000000e+00> : vector<8xf32>
    %18 = vector.multi_reduction <add>, %17, %cst_12 [1] : vector<8x4xf32> to vector<8xf32>
    %19 = vector.shape_cast %18 : vector<8xf32> to vector<8x1xf32>
    %20 = vector.broadcast %19 : vector<8x1xf32> to vector<8x4xf32>
    %21 = arith.divf %17, %20 : vector<8x4xf32>
    %c0_13 = arith.constant 0 : index
    %c0_14 = arith.constant 0 : index
    %22 = vector.load %arg6[%c0_13, %c0_14] : memref<8x4xf32, #tpu.memory_space<vmem>>, vector<8x4xf32>
    tpu.vector_store %arg6[%c0_13, %c0_14], %21 {strides = array<i32>} : memref<8x4xf32, #tpu.memory_space<vmem>>, vector<8x4xf32>,
    return
  }
  func.func @transform_0(%arg0: i32) -> (i32, i32) {
    %c0_i32 = arith.constant 0 : i32
    %c0_i32_0 = arith.constant 0 : i32
    return %arg0, %c0_i32 : i32, i32
  }
  func.func @transform_1(%arg0: i32) -> (i32, i32) {
    %c0_i32 = arith.constant 0 : i32
    %c0_i32_0 = arith.constant 0 : i32
    %c0_i32_1 = arith.constant 0 : i32
    return %c0_i32, %c0_i32_0 : i32, i32
  }
  func.func @transform_2(%arg0: i32) -> (i32, i32) {
    %c0_i32 = arith.constant 0 : i32
    %c0_i32_0 = arith.constant 0 : i32
    %c0_i32_1 = arith.constant 0 : i32
    return %c0_i32, %c0_i32_0 : i32, i32
  }
  func.func @transform_3(%arg0: i32) -> (i32, i32) {
    %c0_i32 = arith.constant 0 : i32
    %c0_i32_0 = arith.constant 0 : i32
    %c0_i32_1 = arith.constant 0 : i32
    return %c0_i32, %c0_i32_0 : i32, i32
  }
  func.func @transform_4(%arg0: i32) -> (i32, i32) {
    %c0_i32 = arith.constant 0 : i32
    %c0_i32_0 = arith.constant 0 : i32
    %c0_i32_1 = arith.constant 0 : i32
    return %c0_i32, %c0_i32_0 : i32, i32
  }
  func.func @transform_5(%arg0: i32) -> (i32, i32) {
    %c0_i32 = arith.constant 0 : i32
    %c0_i32_0 = arith.constant 0 : i32
    return %arg0, %c0_i32 : i32, i32
  }
}

</mosaic_0001>

<bundles_post_ra>
// kernel: tpu_custom_call.1
= control target key start
LH: loop header
LB: loop body
LE: loop exit
PB: predicated region body
PF: predicated region fallthrough
CT: control target
= control target key end

     0   :  { %vm29_vm0 = vcmask 64512   ;;  %v282_v0 = vmov 0.0   ;;  %vm283_vm1 = vmmov 0   ;;  %vm197_vm2 = vcmask 31744   ;;  %s380_s1 = inlined_call_operand.vmem [shape: f32[8,128], index: 1, kind: input, shape index: {}]   ;;  %s381_s0 = inlined_call_operand.vmem [shape: f32[8,8], index: 0, kind: input, shape index: {}]   ;;  %s382_s3 = inlined_call_operand.vmem [shape: f32[128,4], index: 3, kind: input, shape index: {}]   ;;  %s383_s2 = inlined_call_operand.vmem [shape: f32[1,128], index: 2, kind: input, shape index: {}]   ;;  %s384_s4 = inlined_call_operand.vmem [shape: f32[1,4], index: 4, kind: input, shape index: {}]   ;;  %s385_s5 = inlined_call_operand.vmem [shape: f32[8,4], index: 5, kind: output, shape index: {}]  }
   0x1   :  { %236 = vmatprep.subr.mxu0 %v282_v0  ;;  %v21_v1 = vld [vmem:[%s380_s1] sm:$0xff]  ;;  %238 = vmatprep.mubr.msk.f32.mxu0 %vm283_vm1, %v282_v0  ;;  %v119_v3 = vld [vmem:[%s382_s3 + $0x78] sm:$0xff]  ;;  %v118_v4 = vld [vmem:[%s382_s3 + $0x70] sm:$0xff] }
   0x2   :  { %v20_v2 = vld [vmem:[%s381_s0] sm:$0xff]  ;;  %237 = vmatpush3.msra.mxu0 %v21_v1  ;;  %241 = vmatprep.subr.mxu1 %v282_v0  ;;  %v117_v5 = vld [vmem:[%s382_s3 + $0x68] sm:$0xff]  ;;  %v115_v7 = vld [vmem:[%s382_s3 + $0x58] sm:$0xff] }
   0x3   :  { %239 = vmatmul.mubr.msk.f32.vlgmr.msra.gmra.mxu0 %vm29_vm0, %v20_v2  ;;  %242 = vmatpush3.msra.mxu1 %v119_v3  ;;  %v116_v6 = vld [vmem:[%s382_s3 + $0x60] sm:$0xff]  ;;  %v114_v8 = vld [vmem:[%s382_s3 + $0x50] sm:$0xff]  ;;  %v113_v9 = vld [vmem:[%s382_s3 + $0x48] sm:$0xff] }
   0x4   :  { %243 = vmatprep.subr.mxu1 %v282_v0  ;;  %273 = vmatprep.mubr.msk.f32.mxu1 %vm283_vm1, %v282_v0  ;;  %v112_v10 = vld [vmem:[%s382_s3 + $0x40] sm:$0xff]  ;;  %v111_v11 = vld [vmem:[%s382_s3 + $0x38] sm:$0xff]  ;;  %v110_v12 = vld [vmem:[%s382_s3 + $0x30] sm:$0xff] }
   0x5   :  { %244 = vmatpush3.msra.mxu1 %v118_v4  ;;  %v109_v13 = vld [vmem:[%s382_s3 + $0x28] sm:$0xff]  ;;  %v108_v14 = vld [vmem:[%s382_s3 + $0x20] sm:$0xff]  ;;  %v107_v15 = vld [vmem:[%s382_s3 + $0x18] sm:$0xff] }
   0x6   :  { %245 = vmatprep.subr.mxu1 %v282_v0  ;;  %v106_v16 = vld [vmem:[%s382_s3 + $0x10] sm:$0xff]  ;;  %v105_v17 = vld [vmem:[%s382_s3 + $0x8] sm:$0xff]  ;;  %v104_v18 = vld [vmem:[%s382_s3] sm:$0xff] }
   0x7   :  { %246 = vmatpush3.msra.mxu1 %v117_v5  ;;  %v214_v19 = vld [vmem:[%s383_s2] ss:$0 sm:$0xff] }
   0x8   :  { %247 = vmatprep.subr.mxu1 %v282_v0  ;;  %v216_v24 = vld [vmem:[%s384_s4] ss:$0 sm:$0xff] }
   0x9   :  { %248 = vmatpush3.msra.mxu1 %v116_v6 }
   0xa   :  { %249 = vmatprep.subr.mxu1 %v282_v0 }
   0xb   :  { %250 = vmatpush3.msra.mxu1 %v115_v7 }
   0xc   :  { %251 = vmatprep.subr.mxu1 %v282_v0 }
   0xd   :  { %252 = vmatpush3.msra.mxu1 %v114_v8 }
   0xe   :  { %253 = vmatprep.subr.mxu1 %v282_v0 }
   0xf   :  { %254 = vmatpush3.msra.mxu1 %v113_v9 }
  0x10   :  { %255 = vmatprep.subr.mxu1 %v282_v0 }
  0x11   :  { %256 = vmatpush3.msra.mxu1 %v112_v10 }
  0x12   :  { %257 = vmatprep.subr.mxu1 %v282_v0 }
  0x13   :  { %258 = vmatpush3.msra.mxu1 %v111_v11 }
  0x14   :  { %259 = vmatprep.subr.mxu1 %v282_v0 }
  0x15   :  { %260 = vmatpush3.msra.mxu1 %v110_v12 }
  0x16   :  { %261 = vmatprep.subr.mxu1 %v282_v0 }
  0x17   :  { %262 = vmatpush3.msra.mxu1 %v109_v13 }
  0x18   :  { %263 = vmatprep.subr.mxu1 %v282_v0 }
  0x19   :  { %264 = vmatpush3.msra.mxu1 %v108_v14 }
  0x1a   :  { %265 = vmatprep.subr.mxu1 %v282_v0 }
  0x1b   :  { %266 = vmatpush3.msra.mxu1 %v107_v15 }
  0x1c   :  { %267 = vmatprep.subr.mxu1 %v282_v0 }
  0x1d   :  { %268 = vmatpush3.msra.mxu1 %v106_v16 }
  0x1e   :  { %269 = vmatprep.subr.mxu1 %v282_v0 }
  0x1f   :  { %270 = vmatpush3.msra.mxu1 %v105_v17 }
  0x20   :  { %271 = vmatprep.subr.mxu1 %v282_v0 }
  0x21   :  { %272 = vmatpush3.msra.mxu1 %v104_v18 }
  0xc3   :  { %v99_v20 = vpop.f32.mrf.mxu0 }
  0xc4   :  { %v100_v21 = vadd.f32 %v214_v19, %v99_v20 }
  0xc5   :  { %v240_v22 = vpop.f32.mrf.mxu0 }
  0xc6   :  { %v103_v23 = vmax.f32 %v100_v21, 0.0 }
  0xc8   :  { %274 = vmatmul.mubr.f32.vlgmr.msra.gmra.mxu1 %v103_v23 }
 0x188   :  { %v193_v25 = vpop.f32.mrf.mxu1 }
 0x189   :  { %v194_v26 = vadd.f32 %v216_v24, %v193_v25 }
 0x18a   :  { %v275_v27 = vpop.f32.mrf.mxu1 }
 0x18b   :  { %v198_v28 = vsel %vm197_vm2, %v194_v26, -inf }
 0x18c   :  { %199 = vmax.xlane.f32.xlu0 %v198_v28 }
 0x215   :  { %v200_v29 = vpop.xlane.xlu0 %199 }
 0x216   :  { %v201_v30 = vsub.f32 %v194_v26, %v200_v29 }
 0x218   :  { %v202_v31 = vmul.f32 1.442695, %v201_v30 }
 0x21a   :  { %278 = vpow2.f32 %v202_v31 }
 0x227   :  { %v279_v32 = vpop.eup %278 }
 0x228   :  { %v204_v33 = vsel %vm197_vm2, %v279_v32, 0.0 }
 0x229   :  { %205 = vadd.xlane.f32.xlu0 %v204_v33 }
 0x2b2   :  { %v206_v34 = vpop.xlane.xlu0 %205 }
 0x2b3   :  { %280 = vrcp.f32 %v206_v34 }
 0x2c0   :  { %v281_v35 = vpop.eup %280 }
 0x2c1   :  { %v208_v36 = vmul.f32 %v281_v35, %v279_v32 }
 0x2c3   :  { %209 = vst.msk [vmem:[%s385_s5] sm:$0xff] %vm197_vm2, %v208_v36 }

</bundles_post_ra>
